<compile_context>
chip_gen: v7x
topology: tpu7x:2x2x1
jax: 0.10.0
libtpu: 0.0.40
codegen_flags: <defaults>
</compile_context>

<pallas_src>
import jax
import jax.numpy as jnp
from jax.experimental import pallas as pl
from jax.experimental.pallas import tpu as pltpu

LEAKY_SLOPE = 0.01  # torch.nn.LeakyReLU default negative_slope

HID1 = 512
HID2 = 256


def _leaky_relu(x):
    # max-form LeakyReLU: 2 VALU ops (mul + max) instead of cmp + mul + select.
    # Valid because 0 < slope < 1.
    return jnp.maximum(x, LEAKY_SLOPE * x)


def _qnet_kernel(x_ref, w1_ref, b1_ref, w2_ref, b2_ref, w3_ref, b3_ref, out_ref):
    # Layer 1: (TB, Din)bf16 @ (Din, 512)bf16 -> f32 acc, then bf16 bias+LeakyReLU.
    h1 = jnp.dot(x_ref[...], w1_ref[...], preferred_element_type=jnp.float32)
    h1 = _leaky_relu(h1.astype(jnp.bfloat16) + b1_ref[...])
    # Layer 2: h1 is already bf16 -> straight into the MXU.
    h2 = jnp.dot(h1, w2_ref[...], preferred_element_type=jnp.float32)
    h2 = _leaky_relu(h2.astype(jnp.bfloat16) + b2_ref[...])
    # Layer 3: final bias add / output in f32.
    q = jnp.dot(h2, w3_ref[...], preferred_element_type=jnp.float32)
    out_ref[...] = (q + b3_ref[...]).astype(out_ref.dtype)


def _cdiv(a, b):
    return (a + b - 1) // b


def _round_up(n, m):
    return (n + m - 1) // m * m


def qnetwork_forward(x, params, *, block_b=1024):
    """x: (B, input_shape) float. params: dict of w1,b1,w2,b2,w3,b3 (f32).

    Returns (B, outputs) float32 Q-values.
    """
    B, d_in = x.shape
    n_out = params["w3"].shape[1]

    # ---- batch tiling: minimise padding, keep >=2 tiles for v7x megacore ----
    num_tiles = _cdiv(B, block_b)
    if B >= 16:                      # only split if there are >=2 sublane groups
        num_tiles = max(num_tiles, 2)
    tb = _round_up(_cdiv(B, num_tiles), 8)
    grid_b = _cdiv(B, tb)
    b_pad = grid_b * tb

    # ---- lane-dense feature padding (zeros -> mathematically exact) ----
    d_in_pad = _round_up(d_in, 128)
    n_out_pad = _round_up(n_out, 128)

    x_bf16 = jnp.pad(x.astype(jnp.bfloat16),
                     ((0, b_pad - B), (0, d_in_pad - d_in)))

    # Weights to bf16 once (halves weight DMA bytes, native MXU path).
    w1 = jnp.pad(params["w1"].astype(jnp.bfloat16), ((0, d_in_pad - d_in), (0, 0)))
    w2 = params["w2"].astype(jnp.bfloat16)
    w3 = jnp.pad(params["w3"].astype(jnp.bfloat16), ((0, 0), (0, n_out_pad - n_out)))
    # Hidden-layer biases in bf16 (bf16 elementwise path); final bias stays f32.
    b1 = params["b1"].astype(jnp.bfloat16)
    b2 = params["b2"].astype(jnp.bfloat16)
    b3 = jnp.pad(params["b3"].astype(jnp.float32), ((0, 0), (0, n_out_pad - n_out)))

    # Weights/biases: full-array blocks with constant index_map -> DMA'd once,
    # resident in VMEM across all batch grid steps.
    def resident(shape):
        return pl.BlockSpec(shape, lambda i: tuple(0 for _ in shape))

    flops = 2 * b_pad * (d_in_pad * HID1 + HID1 * HID2 + HID2 * n_out_pad)
    bytes_accessed = (
        x_bf16.size * 2
        + (w1.size + w2.size + w3.size) * 2
        + (b1.size + b2.size) * 2 + b3.size * 4
        + b_pad * n_out_pad * 4
    )

    out = pl.pallas_call(
        _qnet_kernel,
        out_shape=jax.ShapeDtypeStruct((b_pad, n_out_pad), jnp.float32),
        grid_spec=pltpu.PrefetchScalarGridSpec(
            num_scalar_prefetch=0,
            grid=(grid_b,),
            in_specs=[
                pl.BlockSpec((tb, d_in_pad), lambda i: (i, 0)),  # x: pipelined row tiles
                resident(w1.shape), resident(b1.shape),
                resident(w2.shape), resident(b2.shape),
                resident(w3.shape), resident(b3.shape),
            ],
            out_specs=pl.BlockSpec((tb, n_out_pad), lambda i: (i, 0)),
        ),
        compiler_params=pltpu.CompilerParams(
            dimension_semantics=("parallel",),        # shard batch across v7x's 2 TCs
            vmem_limit_bytes=32 * 1024 * 1024,        # headroom for big tiles on v5e
        ),
        cost_estimate=pl.CostEstimate(
            flops=flops, transcendentals=0, bytes_accessed=bytes_accessed),
    )(x_bf16, w1, b1, w2, b2, w3, b3)

    return out[:B, :n_out]


def init_params(key, input_shape, outputs):
    """Deterministic init mimicking torch.nn.Linear (uniform +/- 1/sqrt(fan_in))."""
    def linear(k, fan_in, fan_out):
        kw, kb = jax.random.split(k)
        bound = 1.0 / jnp.sqrt(fan_in)
        w = jax.random.uniform(kw, (fan_in, fan_out), jnp.float32, -bound, bound)
        b = jax.random.uniform(kb, (1, fan_out), jnp.float32, -bound, bound)
        return w, b

    k1, k2, k3 = jax.random.split(key, 3)
    w1, b1 = linear(k1, input_shape, HID1)
    w2, b2 = linear(k2, HID1, HID2)
    w3, b3 = linear(k3, HID2, outputs)
    return {"w1": w1, "b1": b1, "w2": w2, "b2": b2, "w3": w3, "b3": b3}


def qnetwork_ref(x, p):
    """Plain-JAX reference mirroring the kernel's bf16-matmul / bf16-elementwise math."""
    def mm(a_bf16, w):
        return jnp.dot(a_bf16, w.astype(jnp.bfloat16),
                       preferred_element_type=jnp.float32)
    h1 = mm(x.astype(jnp.bfloat16), p["w1"]).astype(jnp.bfloat16) + p["b1"].astype(jnp.bfloat16)
    h1 = _leaky_relu(h1)
    h2 = mm(h1, p["w2"]).astype(jnp.bfloat16) + p["b2"].astype(jnp.bfloat16)
    h2 = _leaky_relu(h2)
    return mm(h2, p["w3"]) + p["b3"]


def qnetwork_ref_f32(x, p):
    """Full-precision reference (matches the PyTorch module's math)."""
    h1 = _leaky_relu(x @ p["w1"] + p["b1"])
    h2 = _leaky_relu(h1 @ p["w2"] + p["b2"])
    return h2 @ p["w3"] + p["b3"]


if __name__ == "__main__":
    batch = 8
    input_shape = 32   # feature dim fed to the first Linear
    outputs = 8        # number of Q-values (actions)

    key = jax.random.PRNGKey(0)
    kx, kp = jax.random.split(key)
    x = jax.random.normal(kx, (batch, input_shape), jnp.float32)
    params = init_params(kp, input_shape, outputs)

    q = qnetwork_forward(x, params)
    q = jax.block_until_ready(q)

    assert q.shape == (batch, outputs)

    # Tight check against a reference that mirrors the bf16 boundaries.
    q_ref = qnetwork_ref(x, params)
    assert jnp.allclose(q, q_ref, atol=1e-2, rtol=1e-2), (
        float(jnp.max(jnp.abs(q - q_ref))))

    # Looser sanity check against the full-f32 (PyTorch-equivalent) math.
    q_ref32 = qnetwork_ref_f32(x, params)
    assert jnp.allclose(q, q_ref32, atol=5e-2, rtol=5e-2), (
        float(jnp.max(jnp.abs(q - q_ref32))))

    # Exercise the multi-tile / minimal-padding path once as well (B=260 -> 2 tiles).
    xb = jax.random.normal(kx, (260, input_shape), jnp.float32)
    qb = jax.block_until_ready(qnetwork_forward(xb, params))
    assert qb.shape == (260, outputs)
    assert jnp.allclose(qb, qnetwork_ref(xb, params), atol=1e-2, rtol=1e-2)

    print("KERNEL_OK")
</pallas_src>

<mosaic_0001>
module attributes {stable_mosaic.version = 11 : i64} {
  func.func @_qnet_kernel(%arg0: i32, %arg1: memref<8x128xbf16, #tpu.memory_space<vmem>>, %arg2: memref<128x512xbf16, #tpu.memory_space<vmem>>, %arg3: memref<1x512xbf16, #tpu.memory_space<vmem>>, %arg4: memref<512x256xbf16, #tpu.memory_space<vmem>>, %arg5: memref<1x256xbf16, #tpu.memory_space<vmem>>, %arg6: memref<256x128xbf16, #tpu.memory_space<vmem>>, %arg7: memref<1x128xf32, #tpu.memory_space<vmem>>, %arg8: memref<8x128xf32, #tpu.memory_space<vmem>>) attributes {dimension_semantics = [#tpu.dimension_semantics<parallel>], iteration_bounds = array<i64: 1>, scalar_prefetch = 0 : i64, scratch_operands = 0 : i64, tpu.core_type = #tpu.core_type<tc>, window_params = [{transform_indices = @transform_0, window_bounds = array<i64: 8, 128>}, {pipeline_mode = #tpu.pipeline_mode<synchronous>, transform_indices = @transform_1, window_bounds = array<i64: 128, 512>}, {pipeline_mode = #tpu.pipeline_mode<synchronous>, transform_indices = @transform_2, window_bounds = array<i64: 1, 512>}, {pipeline_mode = #tpu.pipeline_mode<synchronous>, transform_indices = @transform_3, window_bounds = array<i64: 512, 256>}, {pipeline_mode = #tpu.pipeline_mode<synchronous>, transform_indices = @transform_4, window_bounds = array<i64: 1, 256>}, {pipeline_mode = #tpu.pipeline_mode<synchronous>, transform_indices = @transform_5, window_bounds = array<i64: 256, 128>}, {pipeline_mode = #tpu.pipeline_mode<synchronous>, transform_indices = @transform_6, window_bounds = array<i64: 1, 128>}, {transform_indices = @transform_7, window_bounds = array<i64: 8, 128>}]} {
    %c0 = arith.constant 0 : index
    %c0_0 = arith.constant 0 : index
    %0 = vector.load %arg1[%c0, %c0_0] : memref<8x128xbf16, #tpu.memory_space<vmem>>, vector<8x128xbf16>
    %c0_1 = arith.constant 0 : index
    %c0_2 = arith.constant 0 : index
    %1 = vector.load %arg2[%c0_1, %c0_2] : memref<128x512xbf16, #tpu.memory_space<vmem>>, vector<128x512xbf16>
    %cst = arith.constant dense<0.000000e+00> : vector<8x512xf32>
    %2 = tpu.matmul %0, %1, %cst {dimension_numbers = #tpu.dot_dimension_numbers<[1], [0], [0], [1], [0, 0, 1, 1], [], []>} : vector<8x128xbf16>, vector<128x512xbf16>, vector<8x512xf32> -> vector<8x512xf32>
    %3 = arith.truncf %2 : vector<8x512xf32> to vector<8x512xbf16>
    %c0_3 = arith.constant 0 : index
    %c0_4 = arith.constant 0 : index
    %4 = vector.load %arg3[%c0_3, %c0_4] : memref<1x512xbf16, #tpu.memory_space<vmem>>, vector<1x512xbf16>
    %5 = vector.broadcast %4 : vector<1x512xbf16> to vector<8x512xbf16>
    %6 = arith.addf %3, %5 : vector<8x512xbf16>
    %cst_5 = arith.constant 1.000980e-02 : bf16
    %7 = vector.broadcast %cst_5 : bf16 to vector<8x512xbf16>
    %8 = arith.mulf %7, %6 : vector<8x512xbf16>
    %9 = arith.maximumf %6, %8 : vector<8x512xbf16>
    %c0_6 = arith.constant 0 : index
    %c0_7 = arith.constant 0 : index
    %10 = vector.load %arg4[%c0_6, %c0_7] : memref<512x256xbf16, #tpu.memory_space<vmem>>, vector<512x256xbf16>
    %cst_8 = arith.constant dense<0.000000e+00> : vector<8x256xf32>
    %11 = tpu.matmul %9, %10, %cst_8 {dimension_numbers = #tpu.dot_dimension_numbers<[1], [0], [0], [1], [0, 0, 1, 1], [], []>} : vector<8x512xbf16>, vector<512x256xbf16>, vector<8x256xf32> -> vector<8x256xf32>
    %12 = arith.truncf %11 : vector<8x256xf32> to vector<8x256xbf16>
    %c0_9 = arith.constant 0 : index
    %c0_10 = arith.constant 0 : index
    %13 = vector.load %arg5[%c0_9, %c0_10] : memref<1x256xbf16, #tpu.memory_space<vmem>>, vector<1x256xbf16>
    %14 = vector.broadcast %13 : vector<1x256xbf16> to vector<8x256xbf16>
    %15 = arith.addf %12, %14 : vector<8x256xbf16>
    %cst_11 = arith.constant 1.000980e-02 : bf16
    %16 = vector.broadcast %cst_11 : bf16 to vector<8x256xbf16>
    %17 = arith.mulf %16, %15 : vector<8x256xbf16>
    %18 = arith.maximumf %15, %17 : vector<8x256xbf16>
    %c0_12 = arith.constant 0 : index
    %c0_13 = arith.constant 0 : index
    %19 = vector.load %arg6[%c0_12, %c0_13] : memref<256x128xbf16, #tpu.memory_space<vmem>>, vector<256x128xbf16>
    %cst_14 = arith.constant dense<0.000000e+00> : vector<8x128xf32>
    %20 = tpu.matmul %18, %19, %cst_14 {dimension_numbers = #tpu.dot_dimension_numbers<[1], [0], [0], [1], [0, 0, 1, 1], [], []>} : vector<8x256xbf16>, vector<256x128xbf16>, vector<8x128xf32> -> vector<8x128xf32>
    %c0_15 = arith.constant 0 : index
    %c0_16 = arith.constant 0 : index
    %21 = vector.load %arg7[%c0_15, %c0_16] : memref<1x128xf32, #tpu.memory_space<vmem>>, vector<1x128xf32>
    %22 = vector.broadcast %21 : vector<1x128xf32> to vector<8x128xf32>
    %23 = arith.addf %20, %22 : vector<8x128xf32>
    %c0_17 = arith.constant 0 : index
    %c0_18 = arith.constant 0 : index
    %24 = vector.load %arg8[%c0_17, %c0_18] : memref<8x128xf32, #tpu.memory_space<vmem>>, vector<8x128xf32>
    tpu.vector_store %arg8[%c0_17, %c0_18], %23 {strides = array<i32>} : memref<8x128xf32, #tpu.memory_space<vmem>>, vector<8x128xf32>,
    return
  }
  func.func @transform_0(%arg0: i32) -> (i32, i32) {
    %c0_i32 = arith.constant 0 : i32
    %c0_i32_0 = arith.constant 0 : i32
    return %arg0, %c0_i32 : i32, i32
  }
  func.func @transform_1(%arg0: i32) -> (i32, i32) {
    %c0_i32 = arith.constant 0 : i32
    %c0_i32_0 = arith.constant 0 : i32
    %c0_i32_1 = arith.constant 0 : i32
    return %c0_i32, %c0_i32_0 : i32, i32
  }
  func.func @transform_2(%arg0: i32) -> (i32, i32) {
    %c0_i32 = arith.constant 0 : i32
    %c0_i32_0 = arith.constant 0 : i32
    %c0_i32_1 = arith.constant 0 : i32
    return %c0_i32, %c0_i32_0 : i32, i32
  }
  func.func @transform_3(%arg0: i32) -> (i32, i32) {
    %c0_i32 = arith.constant 0 : i32
    %c0_i32_0 = arith.constant 0 : i32
    %c0_i32_1 = arith.constant 0 : i32
    return %c0_i32, %c0_i32_0 : i32, i32
  }
  func.func @transform_4(%arg0: i32) -> (i32, i32) {
    %c0_i32 = arith.constant 0 : i32
    %c0_i32_0 = arith.constant 0 : i32
    %c0_i32_1 = arith.constant 0 : i32
    return %c0_i32, %c0_i32_0 : i32, i32
  }
  func.func @transform_5(%arg0: i32) -> (i32, i32) {
    %c0_i32 = arith.constant 0 : i32
    %c0_i32_0 = arith.constant 0 : i32
    %c0_i32_1 = arith.constant 0 : i32
    return %c0_i32, %c0_i32_0 : i32, i32
  }
  func.func @transform_6(%arg0: i32) -> (i32, i32) {
    %c0_i32 = arith.constant 0 : i32
    %c0_i32_0 = arith.constant 0 : i32
    %c0_i32_1 = arith.constant 0 : i32
    return %c0_i32, %c0_i32_0 : i32, i32
  }
  func.func @transform_7(%arg0: i32) -> (i32, i32) {
    %c0_i32 = arith.constant 0 : i32
    %c0_i32_0 = arith.constant 0 : i32
    return %arg0, %c0_i32 : i32, i32
  }
}

</mosaic_0001>

<bundles_post_ra>
// kernel: tpu_custom_call.1
= control target key start
LH: loop header
LB: loop body
LE: loop exit
PB: predicated region body
PF: predicated region fallthrough
CT: control target
= control target key end

     0   :  { %12 = vsyncpa [#allocation3], 0  ;;  %s1710_s0 = inlined_call_operand.hbm [shape: bf16[8,128], index: 0, kind: input, shape index: {}]   ;;  %s1711_s1 = inlined_call_operand.hbm [shape: bf16[128,512], index: 1, kind: input, shape index: {}]   ;;  %s1712_s2 = inlined_call_operand.vmem [shape: bf16[1,512], index: 2, kind: input, shape index: {}]   ;;  %s1713_s3 = inlined_call_operand.hbm [shape: bf16[512,256], index: 3, kind: input, shape index: {}]   ;;  %s1714_s4 = inlined_call_operand.vmem [shape: bf16[1,256], index: 4, kind: input, shape index: {}]   ;;  %s1715_s5 = inlined_call_operand.hbm [shape: bf16[256,128], index: 5, kind: input, shape index: {}]   ;;  %s1716_s6 = inlined_call_operand.vmem [shape: f32[1,128], index: 6, kind: input, shape index: {}]   ;;  %s1717_s7 = inlined_call_operand.hbm [shape: f32[8,128], index: 7, kind: output, shape index: {}]  }
   0x1   :  { %13 = vsyncpa [#allocation6], 0 }
   0x2   :  { %14 = vsyncpa [#allocation9], 0 }
   0x3   :  { %15 = vsyncpa [#allocation4], 0  ;;  %s1564_s24 = smov [#allocation5]   ;;  %s1446_s28 = scalar_lea.hbm %s1711_s1, 4096 }
   0x4   :  { %s31_s25 = sshll.u32 %s1564_s24, 4  ;;  %p1447_p0 = scmp.ne.s32.totalorder %s1711_s1, %s1446_s28  ;;  %s32_s25 = int_to_ptr.vmem [resolvable:$true] %s31_s25 }
   0x5   :  { %p1450_p1 = scmp.lt.u32.totalorder %s1446_s28, %s1711_s1 }
   0x7   :  { %p1452_p2 = pnand %p1450_p1, %p1447_p0 }
   0x9   :  { %1455 = shalt.err (!%p1452_p2)
}
   0xa   :  { %s1456_s10 = scalar_lea.vmem %s32_s25, 4096  ;;  %p1461_p4 = scmp.lt.s32.totalorder %s32_s25, %s32_s25 }
   0xb   :  { %p1457_p3 = scmp.ne.s32.totalorder %s32_s25, %s1456_s10  ;;  %p1462_p5 = scmp.lt.s32.totalorder %s1456_s10, %s1456_s10 }
   0xd   :  { %p1463_p6 = por %p1462_p5, %p1461_p4 }
   0xf   :  { %p1464_p7 = pnand %p1463_p6, %p1457_p3 }
  0x11   :  { %1467 = shalt.err (!%p1464_p7)
}
  0x12   :  { %s1565_s11 = smov 256   ;;  %s1566_s12 = smov 16  }
  0x13   :  { %37 = dma.hbm_to_vmem [thread:$0]  %s1711_s1, 4096, %s32_s25, [#allocation6], %s1565_s11, %s1565_s11, %s1566_s12  }
  0x14   :  { %s1567_s15 = smov [#allocation2]   ;;  %s1568_s17 = smov [#allocation7]  }
  0x15   :  { %s22_s16 = sshll.u32 %s1567_s15, 4  ;;  %s45_s18 = sshll.u32 %s1568_s17, 4  ;;  %s23_s16 = int_to_ptr.vmem [resolvable:$true] %s22_s16  ;;  %s46_s18 = int_to_ptr.vmem [resolvable:$true] %s45_s18 }
  0x16   :  { %s1468_s21 = scalar_lea.hbm %s1710_s0, 64 }
  0x17   :  { %p1469_p8 = scmp.ne.s32.totalorder %s1710_s0, %s1468_s21  ;;  %p1472_p9 = scmp.lt.u32.totalorder %s1468_s21, %s1710_s0 }
  0x19   :  { %p1474_p10 = pnand %p1472_p9, %p1469_p8 }
  0x1b   :  { %1477 = shalt.err (!%p1474_p10)
}
  0x1c   :  { %s1478_s1 = scalar_lea.vmem %s23_s16, 64  ;;  %p1483_p12 = scmp.lt.s32.totalorder %s23_s16, %s23_s16 }
  0x1d   :  { %p1479_p11 = scmp.ne.s32.totalorder %s23_s16, %s1478_s1  ;;  %p1484_p13 = scmp.lt.s32.totalorder %s1478_s1, %s1478_s1 }
  0x1f   :  { %p1485_p0 = por %p1484_p13, %p1483_p12 }
  0x21   :  { %p1486_p1 = pnand %p1485_p0, %p1479_p11 }
  0x23   :  { %1489 = shalt.err (!%p1486_p1)
}
  0x24   :  { %25 = dma.hbm_to_vmem [thread:$0]  %s1710_s0, 64, %s23_s16, [#allocation3]  }
  0x25   :  { %s1490_s30 = scalar_lea.hbm %s1713_s3, 8192 }
  0x26   :  { %p1491_p2 = scmp.ne.s32.totalorder %s1713_s3, %s1490_s30  ;;  %p1494_p3 = scmp.lt.u32.totalorder %s1490_s30, %s1713_s3 }
  0x28   :  { %p1496_p4 = pnand %p1494_p3, %p1491_p2 }
  0x2a   :  { %1499 = shalt.err (!%p1496_p4)
}
  0x2b   :  { %s1500_s12 = scalar_lea.vmem %s46_s18, 8192  ;;  %p1505_p6 = scmp.lt.s32.totalorder %s46_s18, %s46_s18 }
  0x2c   :  { %p1501_p5 = scmp.ne.s32.totalorder %s46_s18, %s1500_s12  ;;  %p1506_p7 = scmp.lt.s32.totalorder %s1500_s12, %s1500_s12 }
  0x2e   :  { %p1507_p8 = por %p1506_p7, %p1505_p6 }
  0x30   :  { %p1508_p9 = pnand %p1507_p8, %p1501_p5 }
  0x32   :  { %1511 = shalt.err (!%p1508_p9)
}
  0x33   :  { %s1569_s0 = smov 128   ;;  %s1570_s13 = smov 8  }
  0x34   :  { %51 = dma.hbm_to_vmem [thread:$0]  %s1713_s3, 8192, %s46_s18, [#allocation6], %s1569_s0, %s1569_s0, %s1570_s13  }
  0x35   :  { %s1571_s16 = smov [#allocation8]   ;;  %s1512_s21 = scalar_lea.hbm %s1715_s5, 2048 }
  0x36   :  { %s59_s17 = sshll.u32 %s1571_s16, 4  ;;  %p1513_p10 = scmp.ne.s32.totalorder %s1715_s5, %s1512_s21  ;;  %s60_s17 = int_to_ptr.vmem [resolvable:$true] %s59_s17 }
  0x37   :  { %p1516_p11 = scmp.lt.u32.totalorder %s1512_s21, %s1715_s5 }
  0x39   :  { %p1518_p12 = pnand %p1516_p11, %p1513_p10 }
  0x3b   :  { %1521 = shalt.err (!%p1518_p12)
}
  0x3c   :  { %s1522_s1 = scalar_lea.vmem %s60_s17, 2048  ;;  %p1527_p0 = scmp.lt.s32.totalorder %s60_s17, %s60_s17 }
  0x3d   :  { %p1523_p13 = scmp.ne.s32.totalorder %s60_s17, %s1522_s1  ;;  %p1528_p1 = scmp.lt.s32.totalorder %s1522_s1, %s1522_s1 }
  0x3f   :  { %p1529_p2 = por %p1528_p1, %p1527_p0 }
  0x41   :  { %p1530_p3 = pnand %p1529_p2, %p1523_p13 }
  0x43   :  { %1533 = shalt.err (!%p1530_p3)
}
  0x44   :  { %s1572_s3 = smov 64   ;;  %s1573_s18 = smov 4  }
  0x45   :  { %65 = dma.hbm_to_vmem [thread:$0]  %s1715_s5, 2048, %s60_s17, [#allocation9], %s1572_s3, %s1572_s3, %s1573_s18  }
  0x46   :  { %1556 = dma.done.wait [#allocation3], 64  }
  0x47   :  { %1557 = vsyncadd [#allocation3], 4294967232 }
  0x48   :  { %1558 = dma.done.wait [#allocation6], 12288  }
  0x49   :  { %1559 = vsyncadd [#allocation6], 4294955008 }
  0x4a   :  { %1560 = dma.done.wait [#allocation9], 2048  }
  0x4b   :  { %1561 = vsyncadd [#allocation9], 4294965248  ;;  %v1574_v0 = vmov 0   ;;  %v1286_v1 = vld [vmem:[#allocation5 + $0x4] ss:$16 sps:$4 sm:$0xff]   ;;  %s1576_s8 = smov [#allocation10]  }
  0x4c   :  { %307 = vmatprep.mubr.bf16.mxu1 %v1574_v0  ;;  %v1288_v2 = vld [vmem:[#allocation5] ss:$16 sps:$4 sm:$0xff]   ;;  %275 = vmatprep.subr.bf16.mxu1 %v1286_v1  ;;  %v1289_v3 = vld [vmem:[#allocation5 + $0x24] ss:$16 sps:$4 sm:$0xff]   ;;  %v1312_v22 = vld [vmem:[#allocation5 + $0xc] ss:$16 sps:$4 sm:$0xff]  }
  0x4d   :  { %276 = vmatpush1.bf16.msra.mxu1 %v1288_v2  ;;  %v1291_v4 = vld [vmem:[#allocation5 + $0x20] ss:$16 sps:$4 sm:$0xff]   ;;  %v1292_v5 = vld [vmem:[#allocation5 + $0x44] ss:$16 sps:$4 sm:$0xff]   ;;  %v1665_v24 = vld [vmem:[#allocation2] sm:$0xf] }
  0x4e   :  { %277 = vmatprep.subr.bf16.mxu1 %v1289_v3  ;;  %v1294_v6 = vld [vmem:[#allocation5 + $0x40] ss:$16 sps:$4 sm:$0xff]   ;;  %v1295_v7 = vld [vmem:[#allocation5 + $0x64] ss:$16 sps:$4 sm:$0xff]   ;;  %v1310_v26 = vld [vmem:[#allocation5 + $0x8] ss:$16 sps:$4 sm:$0xff]  }
  0x4f   :  { %v1297_v8 = vld [vmem:[#allocation5 + $0x60] ss:$16 sps:$4 sm:$0xff]   ;;  %v1298_v9 = vld [vmem:[#allocation5 + $0x84] ss:$16 sps:$4 sm:$0xff]   ;;  %v1315_v27 = vld [vmem:[#allocation5 + $0x2c] ss:$16 sps:$4 sm:$0xff]  }
  0x50   :  { %v1300_v10 = vld [vmem:[#allocation5 + $0x80] ss:$16 sps:$4 sm:$0xff]   ;;  %v1301_v11 = vld [vmem:[#allocation5 + $0xa4] ss:$16 sps:$4 sm:$0xff]   ;;  %v1313_v30 = vld [vmem:[#allocation5 + $0x28] ss:$16 sps:$4 sm:$0xff]  }
  0x51   :  { %278 = vmatpush1.bf16.msra.mxu1 %v1291_v4  ;;  %v1303_v12 = vld [vmem:[#allocation5 + $0xa0] ss:$16 sps:$4 sm:$0xff]   ;;  %v1304_v13 = vld [vmem:[#allocation5 + $0xc4] ss:$16 sps:$4 sm:$0xff]   ;;  %v1318_v31 = vld [vmem:[#allocation5 + $0x4c] ss:$16 sps:$4 sm:$0xff]  }
  0x52   :  { %279 = vmatprep.subr.bf16.mxu1 %v1292_v5  ;;  %v1306_v14 = vld [vmem:[#allocation5 + $0xc0] ss:$16 sps:$4 sm:$0xff]   ;;  %v1334_v15 = vld [vmem:[#allocation7 + $0x4] ss:$8 sps:$4 sm:$0xff]   ;;  %v1337_v17 = vld [vmem:[#allocation7 + $0x14] ss:$8 sps:$4 sm:$0xff]  }
  0x53   :  { %v1336_v16 = vld [vmem:[#allocation7] ss:$8 sps:$4 sm:$0xff]   ;;  %v1307_v18 = vld [vmem:[#allocation5 + $0xe4] ss:$16 sps:$4 sm:$0xff]   ;;  %811 = vmatprep.subr.bf16.mxu0 %v1334_v15  ;;  %v1339_v19 = vld [vmem:[#allocation7 + $0x10] ss:$8 sps:$4 sm:$0xff]  }
  0x54   :  { %812 = vmatpush1.bf16.msra.mxu0 %v1336_v16  ;;  %v1340_v20 = vld [vmem:[#allocation7 + $0x24] ss:$8 sps:$4 sm:$0xff]   ;;  %v1309_v21 = vld [vmem:[#allocation5 + $0xe0] ss:$16 sps:$4 sm:$0xff]   ;;  %v1343_v25 = vld [vmem:[#allocation7 + $0x34] ss:$8 sps:$4 sm:$0xff]   ;;  %v374_v16 = vlaneseq }
  0x55   :  { %280 = vmatpush1.bf16.msra.mxu1 %v1294_v6  ;;  %813 = vmatprep.subr.bf16.mxu0 %v1337_v17  ;;  %v1342_v23 = vld [vmem:[#allocation7 + $0x20] ss:$8 sps:$4 sm:$0xff]   ;;  %v1345_v28 = vld [vmem:[#allocation7 + $0x30] ss:$8 sps:$4 sm:$0xff]   ;;  %v1346_v29 = vld [vmem:[#allocation7 + $0x44] ss:$8 sps:$4 sm:$0xff]  }
  0x56   :  { %281 = vmatprep.subr.bf16.mxu1 %v1295_v7  ;;  %v1316_v32 = vld [vmem:[#allocation5 + $0x48] ss:$16 sps:$4 sm:$0xff]   ;;  %v1321_v34 = vld [vmem:[#allocation5 + $0x6c] ss:$16 sps:$4 sm:$0xff]   ;;  %v1430_v3 = vld [vmem:[#allocation8 + $0x40] sm:$0xff]   ;;  %s1121_s9 = sshll.u32 %s1576_s8, 4  ;;  %s1122_s9 = int_to_ptr.vmem [resolvable:$true] %s1121_s9 }
  0x57   :  { %v1348_v33 = vld [vmem:[#allocation7 + $0x40] ss:$8 sps:$4 sm:$0xff]   ;;  %v1349_v35 = vld [vmem:[#allocation7 + $0x54] ss:$8 sps:$4 sm:$0xff]   ;;  %v1351_v36 = vld [vmem:[#allocation7 + $0x50] ss:$8 sps:$4 sm:$0xff]   ;;  %p1539_p5 = scmp.lt.s32.totalorder %s1122_s9, %s1122_s9 }
  0x58   :  { %814 = vmatpush1.bf16.msra.mxu0 %v1339_v19  ;;  %v1352_v37 = vld [vmem:[#allocation7 + $0x64] ss:$8 sps:$4 sm:$0xff]   ;;  %v1319_v38 = vld [vmem:[#allocation5 + $0x68] ss:$16 sps:$4 sm:$0xff]   ;;  %v1355_v41 = vld [vmem:[#allocation7 + $0x74] ss:$8 sps:$4 sm:$0xff]  }
  0x59   :  { %282 = vmatpush1.bf16.msra.mxu1 %v1297_v8  ;;  %815 = vmatprep.subr.bf16.mxu0 %v1340_v20  ;;  %v1324_v39 = vld [vmem:[#allocation5 + $0x8c] ss:$16 sps:$4 sm:$0xff]   ;;  %v1354_v40 = vld [vmem:[#allocation7 + $0x60] ss:$8 sps:$4 sm:$0xff]   ;;  %v1357_v44 = vld [vmem:[#allocation7 + $0x70] ss:$8 sps:$4 sm:$0xff]  }
  0x5a   :  { %283 = vmatprep.subr.bf16.mxu1 %v1298_v9  ;;  %v1322_v42 = vld [vmem:[#allocation5 + $0x88] ss:$16 sps:$4 sm:$0xff]   ;;  %v1327_v43 = vld [vmem:[#allocation5 + $0xac] ss:$16 sps:$4 sm:$0xff]   ;;  %v1431_v4 = vld [vmem:[#allocation8] sm:$0xff]   ;;  %s1534_s10 = scalar_lea.vmem %s1122_s9, 128 }
  0x5b   :  { %v1358_v45 = vld [vmem:[#allocation7 + $0x84] ss:$8 sps:$4 sm:$0xff]   ;;  %v1325_v46 = vld [vmem:[#allocation5 + $0xa8] ss:$16 sps:$4 sm:$0xff]   ;;  %v1361_v49 = vld [vmem:[#allocation7 + $0x94] ss:$8 sps:$4 sm:$0xff]   ;;  %p1535_p4 = scmp.ne.s32.totalorder %s1122_s9, %s1534_s10  ;;  %p1540_p6 = scmp.lt.s32.totalorder %s1534_s10, %s1534_s10 }
  0x5c   :  { %816 = vmatpush1.bf16.msra.mxu0 %v1342_v23  ;;  %v1330_v47 = vld [vmem:[#allocation5 + $0xcc] ss:$16 sps:$4 sm:$0xff]   ;;  %v1360_v48 = vld [vmem:[#allocation7 + $0x80] ss:$8 sps:$4 sm:$0xff]   ;;  %v1363_v52 = vld [vmem:[#allocation7 + $0x90] ss:$8 sps:$4 sm:$0xff]  }
  0x5d   :  { %284 = vmatpush1.bf16.msra.mxu1 %v1300_v10  ;;  %817 = vmatprep.subr.bf16.mxu0 %v1343_v25  ;;  %v1328_v50 = vld [vmem:[#allocation5 + $0xc8] ss:$16 sps:$4 sm:$0xff]   ;;  %v1333_v51 = vld [vmem:[#allocation5 + $0xec] ss:$16 sps:$4 sm:$0xff]   ;;  %v1434_v7 = vld [vmem:[#allocation8 + $0x50] sm:$0xff]   ;;  %p1541_p7 = por %p1540_p6, %p1539_p5 }
  0x5e   :  { %285 = vmatprep.subr.bf16.mxu1 %v1301_v11  ;;  %v1364_v53 = vld [vmem:[#allocation7 + $0xa4] ss:$8 sps:$4 sm:$0xff]   ;;  %v1331_v54 = vld [vmem:[#allocation5 + $0xe8] ss:$16 sps:$4 sm:$0xff]   ;;  %v1367_v56 = vld [vmem:[#allocation7 + $0xb4] ss:$8 sps:$4 sm:$0xff]  }
  0x5f   :  { %v1366_v55 = vld [vmem:[#allocation7 + $0xa0] ss:$8 sps:$4 sm:$0xff]   ;;  %v1369_v57 = vld [vmem:[#allocation7 + $0xb0] ss:$8 sps:$4 sm:$0xff]   ;;  %v1370_v58 = vld [vmem:[#allocation7 + $0xc4] ss:$8 sps:$4 sm:$0xff]   ;;  %p1542_p8 = pnand %p1541_p7, %p1535_p4 }
  0x60   :  { %818 = vmatpush1.bf16.msra.mxu0 %v1345_v28  ;;  %v1372_v59 = vld [vmem:[#allocation7 + $0xc0] ss:$8 sps:$4 sm:$0xff]   ;;  %v1373_v60 = vld [vmem:[#allocation7 + $0xd4] ss:$8 sps:$4 sm:$0xff]   ;;  %v1375_v61 = vld [vmem:[#allocation7 + $0xd0] ss:$8 sps:$4 sm:$0xff]  }
  0x61   :  { %286 = vmatpush1.bf16.msra.mxu1 %v1303_v12  ;;  %819 = vmatprep.subr.bf16.mxu0 %v1346_v29  ;;  %v1376_v62 = vld [vmem:[#allocation7 + $0xe4] ss:$8 sps:$4 sm:$0xff]   ;;  %v1378_v63 = vld [vmem:[#allocation7 + $0xe0] ss:$8 sps:$4 sm:$0xff]   ;;  %v1381_v1 = vld [vmem:[#allocation7 + $0xf0] ss:$8 sps:$4 sm:$0xff]  }
  0x62   :  { %287 = vmatprep.subr.bf16.mxu1 %v1304_v13  ;;  %v1384_v2 = vld [vmem:[#allocation7 + $0x104] ss:$8 sps:$4 sm:$0xff]   ;;  %v1435_v8 = vld [vmem:[#allocation8 + $0x10] sm:$0xff]   ;;  %v1436_v9 = vld [vmem:[#allocation8 + $0x58] sm:$0xff]  }
  0x63   :  { %v1432_v5 = vld [vmem:[#allocation8 + $0x48] sm:$0xff]   ;;  %v1437_v10 = vld [vmem:[#allocation8 + $0x18] sm:$0xff]   ;;  %v1438_v11 = vld [vmem:[#allocation8 + $0x60] sm:$0xff]  }
  0x64   :  { %820 = vmatpush1.bf16.msra.mxu0 %v1348_v33  ;;  %v1433_v6 = vld [vmem:[#allocation8 + $0x8] sm:$0xff]   ;;  %v1439_v12 = vld [vmem:[#allocation8 + $0x20] sm:$0xff]   ;;  %v1164_v19 = vld.sshfl [vmem:[%s1712_s2] sm:$0x33 pattern:$0x75316420] }
  0x65   :  { %288 = vmatpush1.bf16.msra.mxu1 %v1306_v14  ;;  %821 = vmatprep.subr.bf16.mxu0 %v1349_v35  ;;  %v1440_v13 = vld [vmem:[#allocation8 + $0x68] sm:$0xff]   ;;  %v1575_v14 = vmov 1966171168  }
  0x66   :  { %289 = vmatprep.subr.bf16.mxu1 %v1307_v18  ;;  %v372_v15 = vunpack.c.l.s4 %v1575_v14  ;;  %v375_v18 = vshrl.u32 %v374_v16, 7  ;;  %v1421_v16 = vld [vmem:[#allocation7 + $0x1d0] ss:$8 sps:$4 sm:$0xff]  }
  0x68   :  { %822 = vmatpush1.bf16.msra.mxu0 %v1351_v36  ;;  %v373_v17 = vunpack.c.0.s8 %v372_v15  ;;  %v1680_v25 = vsub.s32 0, %v375_v18  ;;  %v1423_v15 = vld [vmem:[#allocation7 + $0x1d4] ss:$8 sps:$4 sm:$0xff]  }
  0x69   :  { %290 = vmatpush1.bf16.msra.mxu1 %v1309_v21  ;;  %823 = vmatprep.subr.bf16.mxu0 %v1352_v37  ;;  %v370_v21 = vcombine.high %v1164_v19, %v1164_v19 }
  0x6a   :  { %316 = vmatprep.subr.bf16.mxu1 %v1312_v22  ;;  %v1672_v20 = vsub.s32 %v373_v17, %v375_v18 }
  0x6c   :  { %308 = vmatmul.mubr.bf16.vlgmr.msra.gmra.mrb[0].mxu1 %v1665_v24  ;;  %824 = vmatpush1.bf16.msra.mxu0 %v1354_v40  ;;  %v1675_v22 = vrot.slane %v1164_v19, %v1672_v20  ;;  %v384_v23 = vrot.slane %v370_v21, %v1672_v20  ;;  %v1382_v40 = vld [vmem:[#allocation7 + $0x100] ss:$8 sps:$4 sm:$0xff]   ;;  %v1426_v19 = vld [vmem:[#allocation7 + $0x1e4] ss:$8 sps:$4 sm:$0xff]  }
  0x6d   :  { %317 = vmatpush1.bf16.msra.mxu1 %v1310_v26  ;;  %348 = vmatprep.mubr.bf16.mxu1 %v1574_v0  ;;  %v1379_v0 = vld [vmem:[#allocation7 + $0xf4] ss:$8 sps:$4 sm:$0xff]   ;;  %v1424_v21 = vld [vmem:[#allocation7 + $0x1e0] ss:$8 sps:$4 sm:$0xff]  }
  0x6e   :  { %318 = vmatprep.subr.bf16.mxu1 %v1315_v27  ;;  %825 = vmatprep.subr.bf16.mxu0 %v1355_v41  ;;  %v395_v26 = vpack.i.b16 %v384_v23, %v384_v23 }
  0x70   :  { %826 = vmatpush1.bf16.msra.mxu0 %v1357_v44  ;;  %v400_v29 = vrot.slane %v395_v26, %v1680_v25  ;;  %v1390_v44 = vld [vmem:[#allocation7 + $0x124] ss:$8 sps:$4 sm:$0xff]   ;;  %v1427_v26 = vld [vmem:[#allocation7 + $0x1f0] ss:$8 sps:$4 sm:$0xff]  }
  0x71   :  { %319 = vmatpush1.bf16.msra.mxu1 %v1313_v30  ;;  %827 = vmatprep.subr.bf16.mxu0 %v1358_v45  ;;  %v1388_v45 = vld [vmem:[#allocation7 + $0x120] ss:$8 sps:$4 sm:$0xff]  }
  0x72   :  { %320 = vmatprep.subr.bf16.mxu1 %v1318_v31 }
  0x74   :  { %828 = vmatpush1.bf16.msra.mxu0 %v1360_v48  ;;  %v1396_v48 = vld [vmem:[#allocation7 + $0x144] ss:$8 sps:$4 sm:$0xff]  }
  0x75   :  { %321 = vmatpush1.bf16.msra.mxu1 %v1316_v32  ;;  %829 = vmatprep.subr.bf16.mxu0 %v1361_v49  ;;  %v1394_v49 = vld [vmem:[#allocation7 + $0x140] ss:$8 sps:$4 sm:$0xff]  }
  0x76   :  { %322 = vmatprep.subr.bf16.mxu1 %v1321_v34 }
  0x78   :  { %830 = vmatpush1.bf16.msra.mxu0 %v1363_v52  ;;  %v1397_v52 = vld [vmem:[#allocation7 + $0x150] ss:$8 sps:$4 sm:$0xff]  }
  0x79   :  { %323 = vmatpush1.bf16.msra.mxu1 %v1319_v38  ;;  %831 = vmatprep.subr.bf16.mxu0 %v1364_v53 }
  0x7a   :  { %324 = vmatprep.subr.bf16.mxu1 %v1324_v39 }
  0x7c   :  { %832 = vmatpush1.bf16.msra.mxu0 %v1366_v55  ;;  %v1400_v55 = vld [vmem:[#allocation7 + $0x160] ss:$8 sps:$4 sm:$0xff]  }
  0x7d   :  { %325 = vmatpush1.bf16.msra.mxu1 %v1322_v42  ;;  %833 = vmatprep.subr.bf16.mxu0 %v1367_v56  ;;  %v1387_v42 = vld [vmem:[#allocation7 + $0x114] ss:$8 sps:$4 sm:$0xff]  }
  0x7e   :  { %326 = vmatprep.subr.bf16.mxu1 %v1327_v43  ;;  %v1385_v43 = vld [vmem:[#allocation7 + $0x110] ss:$8 sps:$4 sm:$0xff]  }
  0x80   :  { %834 = vmatpush1.bf16.msra.mxu0 %v1369_v57 }
  0x81   :  { %327 = vmatpush1.bf16.msra.mxu1 %v1325_v46  ;;  %835 = vmatprep.subr.bf16.mxu0 %v1370_v58  ;;  %v1393_v46 = vld [vmem:[#allocation7 + $0x134] ss:$8 sps:$4 sm:$0xff]  }
  0x82   :  { %328 = vmatprep.subr.bf16.mxu1 %v1330_v47  ;;  %v1391_v47 = vld [vmem:[#allocation7 + $0x130] ss:$8 sps:$4 sm:$0xff]   ;;  %v1405_v58 = vld [vmem:[#allocation7 + $0x174] ss:$8 sps:$4 sm:$0xff]  }
  0x84   :  { %836 = vmatpush1.bf16.msra.mxu0 %v1372_v59 }
  0x85   :  { %329 = vmatpush1.bf16.msra.mxu1 %v1328_v50  ;;  %837 = vmatprep.subr.bf16.mxu0 %v1373_v60  ;;  %v386_v50 = vcombine.high %v384_v23, %v384_v23 }
  0x86   :  { %330 = vmatprep.subr.bf16.mxu1 %v1333_v51  ;;  %v1399_v51 = vld [vmem:[#allocation7 + $0x154] ss:$8 sps:$4 sm:$0xff]  }
  0x87   :  { %v409_v53 = vpack.i.b16 %v386_v50, %v386_v50 }
  0x88   :  { %838 = vmatpush1.bf16.msra.mxu0 %v1375_v61 }
  0x89   :  { %331 = vmatpush1.bf16.msra.mxu1 %v1331_v54  ;;  %839 = vmatprep.subr.bf16.mxu0 %v1376_v62  ;;  %v1402_v54 = vld [vmem:[#allocation7 + $0x164] ss:$8 sps:$4 sm:$0xff]   ;;  %v414_v57 = vrot.slane %v409_v53, %v1680_v25  ;;  %v1230_v53 = vld [vmem:[%s1716_s6] ss:$0 sm:$0xff] }
  0x8a   :  { %1247 = vmatprep.subr.bf16.mxu1 %v1430_v3  ;;  %v1406_v3 = vld [vmem:[#allocation7 + $0x180] ss:$8 sps:$4 sm:$0xff]  }
  0x8c   :  { %349 = vmatmul.mubr.bf16.vlgmr.msra.gmra.mrb[4].mxu1 %v1665_v24  ;;  %840 = vmatpush1.bf16.msra.mxu0 %v1378_v63  ;;  %v388_v24 = vpack.i.b16 %v1675_v22, %v1675_v22  ;;  %v1403_v63 = vld [vmem:[#allocation7 + $0x170] ss:$8 sps:$4 sm:$0xff]  }
  0x8d   :  { %841 = vmatprep.subr.bf16.mxu0 %v1379_v0  ;;  %1248 = vmatpush3.bf16.msra.mxu1 %v1431_v4 }
  0x8e   :  { %1249 = vmatprep.subr.bf16.mxu1 %v1432_v5  ;;  %v393_v27 = vrot.slane %v388_v24, %v1680_v25  ;;  %v1411_v5 = vld [vmem:[#allocation7 + $0x194] ss:$8 sps:$4 sm:$0xff]  }
  0x8f   :  { %v1429_v24 = vld [vmem:[#allocation7 + $0x1f4] ss:$8 sps:$4 sm:$0xff]  }
  0x90   :  { %842 = vmatpush1.bf16.msra.mxu0 %v1381_v1  ;;  %v1408_v1 = vld [vmem:[#allocation7 + $0x184] ss:$8 sps:$4 sm:$0xff]  }
  0x91   :  { %852 = vmatprep.subr.bf16.mxu0 %v1384_v2  ;;  %1250 = vmatpush3.bf16.msra.mxu1 %v1433_v6  ;;  %v1409_v6 = vld [vmem:[#allocation7 + $0x190] ss:$8 sps:$4 sm:$0xff]  }
  0x92   :  { %1251 = vmatprep.subr.bf16.mxu1 %v1434_v7  ;;  %v1414_v7 = vld [vmem:[#allocation7 + $0x1a4] ss:$8 sps:$4 sm:$0xff]  }
  0x95   :  { %1252 = vmatpush3.bf16.msra.mxu1 %v1435_v8  ;;  %v1412_v8 = vld [vmem:[#allocation7 + $0x1a0] ss:$8 sps:$4 sm:$0xff]  }
  0x96   :  { %1253 = vmatprep.subr.bf16.mxu1 %v1436_v9  ;;  %v1417_v9 = vld [vmem:[#allocation7 + $0x1b4] ss:$8 sps:$4 sm:$0xff]  }
  0x99   :  { %1254 = vmatpush3.bf16.msra.mxu1 %v1437_v10  ;;  %v1415_v10 = vld [vmem:[#allocation7 + $0x1b0] ss:$8 sps:$4 sm:$0xff]  }
  0x9a   :  { %1255 = vmatprep.subr.bf16.mxu1 %v1438_v11  ;;  %v1420_v11 = vld [vmem:[#allocation7 + $0x1c4] ss:$8 sps:$4 sm:$0xff]  }
  0x9d   :  { %1256 = vmatpush3.bf16.msra.mxu1 %v1439_v12  ;;  %v385_v12 = vcombine.high %v1675_v22, %v1675_v22 }
  0x9e   :  { %1257 = vmatprep.subr.bf16.mxu1 %v1440_v13  ;;  %v1418_v13 = vld [vmem:[#allocation7 + $0x1c0] ss:$8 sps:$4 sm:$0xff]  }
  0x9f   :  { %v402_v14 = vpack.i.b16 %v385_v12, %v385_v12 }
  0xa1   :  { %v407_v18 = vrot.slane %v402_v14, %v1680_v25 }
 0x13f   :  { %v309_v28 = vpop.f32.mrb[0].mxu1 }
 0x140   :  { %v357_v30 = vpack.c.bf16 %v309_v28, %v309_v28  ;;  %v311_v31 = vpop.f32.mrb[1].mxu1  ;;  %v1441_v28 = vld [vmem:[#allocation8 + $0x28] sm:$0xff]  }
 0x141   :  { %v358_v32 = vpack.c.bf16 %v311_v31, %v311_v31  ;;  %v313_v33 = vpop.f32.mrb[2].mxu1  ;;  %1258 = vmatpush3.bf16.msra.mxu1 %v1441_v28  ;;  %v1444_v31 = vld [vmem:[#allocation8 + $0x78] sm:$0xff]  }
 0x142   :  { %v415_v34 = vadd.bf16 %v393_v27, %v357_v30  ;;  %v314_v35 = vpop.f32.mrb[3].mxu1  ;;  %v1443_v30 = vld [vmem:[#allocation8 + $0x30] sm:$0xff]   ;;  %v1229_v33 = vld.sshfl [vmem:[%s1714_s4] sm:$0x11 pattern:$0x75316420] }
 0x143   :  { %v416_v36 = vadd.bf16 %v400_v29, %v358_v32  ;;  %v1442_v29 = vld [vmem:[#allocation8 + $0x70] sm:$0xff]   ;;  %v1445_v32 = vld [vmem:[#allocation8 + $0x38] sm:$0xff]   ;;  %v911_v35 = vrot.slane %v1229_v33, %v1672_v20 }
 0x144   :  { %v419_v37 = vmul.bf16 1009007652, %v415_v34  ;;  %1259 = vmatprep.subr.bf16.mxu1 %v1442_v29 }
 0x145   :  { %v420_v38 = vmul.bf16 1009007652, %v416_v36  ;;  %1260 = vmatpush3.bf16.msra.mxu1 %v1443_v30 }
 0x146   :  { %v423_v41 = vmax.bf16 %v419_v37, %v415_v34  ;;  %1261 = vmatprep.subr.bf16.mxu1 %v1444_v31  ;;  %v904_v34 = vcombine.high %v1229_v33, %v1229_v33  ;;  %v920_v37 = vpack.i.b16 %v911_v35, %v911_v35 }
 0x147   :  { %v424_v39 = vmax.bf16 %v420_v38, %v416_v36 }
 0x148   :  { %v918_v36 = vrot.slane %v904_v34, %v1672_v20 }
 0x149   :  { %843 = vmatprep.mubr.bf16.mxu0 %v424_v39  ;;  %1262 = vmatpush3.bf16.msra.mxu1 %v1445_v32  ;;  %v925_v39 = vrot.slane %v920_v37, %v1680_v25 }
 0x14a   :  { %844 = vmatmul.mubr.bf16.vlgmr.msra.gmra.mrb[0].mxu0 %v423_v41  ;;  %v927_v38 = vpack.i.b16 %v918_v36, %v918_v36 }
 0x14b   :  { %853 = vmatpush1.bf16.msra.mxu0 %v1382_v40 }
 0x14c   :  { %854 = vmatprep.subr.bf16.mxu0 %v1387_v42  ;;  %v932_v41 = vrot.slane %v927_v38, %v1680_v25 }
 0x14f   :  { %855 = vmatpush1.bf16.msra.mxu0 %v1385_v43 }
 0x150   :  { %856 = vmatprep.subr.bf16.mxu0 %v1390_v44 }
 0x153   :  { %857 = vmatpush1.bf16.msra.mxu0 %v1388_v45 }
 0x154   :  { %858 = vmatprep.subr.bf16.mxu0 %v1393_v46 }
 0x157   :  { %859 = vmatpush1.bf16.msra.mxu0 %v1391_v47 }
 0x158   :  { %860 = vmatprep.subr.bf16.mxu0 %v1396_v48 }
 0x15b   :  { %861 = vmatpush1.bf16.msra.mxu0 %v1394_v49 }
 0x15c   :  { %862 = vmatprep.subr.bf16.mxu0 %v1399_v51 }
 0x15f   :  { %863 = vmatpush1.bf16.msra.mxu0 %v1397_v52  ;;  %v350_v56 = vpop.f32.mrb[4].mxu1 }
 0x160   :  { %864 = vmatprep.subr.bf16.mxu0 %v1402_v54  ;;  %v352_v59 = vpop.f32.mrb[5].mxu1  ;;  %v359_v17 = vpack.c.bf16 %v350_v56, %v350_v56 }
 0x161   :  { %v360_v60 = vpack.c.bf16 %v352_v59, %v352_v59  ;;  %v354_v61 = vpop.f32.mrb[6].mxu1 }
 0x162   :  { %v355_v62 = vpop.f32.mrb[7].mxu1  ;;  %v417_v23 = vadd.bf16 %v407_v18, %v359_v17 }
 0x163   :  { %865 = vmatpush1.bf16.msra.mxu0 %v1400_v55  ;;  %v418_v0 = vadd.bf16 %v414_v57, %v360_v60 }
 0x164   :  { %866 = vmatprep.subr.bf16.mxu0 %v1405_v58  ;;  %v421_v22 = vmul.bf16 1009007652, %v417_v23 }
 0x165   :  { %v422_v2 = vmul.bf16 1009007652, %v418_v0 }
 0x166   :  { %v425_v27 = vmax.bf16 %v421_v22, %v417_v23 }
 0x167   :  { %867 = vmatpush1.bf16.msra.mxu0 %v1403_v63  ;;  %v426_v4 = vmax.bf16 %v422_v2, %v418_v0 }
 0x168   :  { %868 = vmatprep.subr.bf16.mxu0 %v1408_v1 }
 0x169   :  { %884 = vmatprep.mubr.bf16.mxu0 %v426_v4 }
 0x16b   :  { %869 = vmatpush1.bf16.msra.mxu0 %v1406_v3 }
 0x16c   :  { %870 = vmatprep.subr.bf16.mxu0 %v1411_v5 }
 0x16f   :  { %871 = vmatpush1.bf16.msra.mxu0 %v1409_v6 }
 0x170   :  { %872 = vmatprep.subr.bf16.mxu0 %v1414_v7 }
 0x173   :  { %873 = vmatpush1.bf16.msra.mxu0 %v1412_v8 }
 0x174   :  { %874 = vmatprep.subr.bf16.mxu0 %v1417_v9 }
 0x177   :  { %875 = vmatpush1.bf16.msra.mxu0 %v1415_v10 }
 0x178   :  { %876 = vmatprep.subr.bf16.mxu0 %v1420_v11 }
 0x17b   :  { %877 = vmatpush1.bf16.msra.mxu0 %v1418_v13 }
 0x17c   :  { %878 = vmatprep.subr.bf16.mxu0 %v1423_v15 }
 0x17f   :  { %879 = vmatpush1.bf16.msra.mxu0 %v1421_v16 }
 0x180   :  { %880 = vmatprep.subr.bf16.mxu0 %v1426_v19 }
 0x183   :  { %881 = vmatpush1.bf16.msra.mxu0 %v1424_v21 }
 0x184   :  { %882 = vmatprep.subr.bf16.mxu0 %v1429_v24 }
 0x187   :  { %883 = vmatpush1.bf16.msra.mxu0 %v1427_v26 }
 0x18a   :  { %885 = vmatmul.mubr.bf16.vlgmr.msra.gmra.mrb[0].mxu0 %v425_v27 }
 0x25d   :  { %v886_v40 = vpop.f32.mrb[0].mxu0 }
 0x25e   :  { %v893_v42 = vpack.c.bf16 %v886_v40, %v886_v40  ;;  %v888_v43 = vpop.f32.mrb[1].mxu0 }
 0x25f   :  { %v894_v44 = vpack.c.bf16 %v888_v43, %v888_v43  ;;  %v890_v45 = vpop.f32.mrb[2].mxu0 }
 0x260   :  { %v933_v46 = vadd.bf16 %v925_v39, %v893_v42  ;;  %v891_v47 = vpop.f32.mrb[3].mxu0 }
 0x261   :  { %v934_v48 = vadd.bf16 %v932_v41, %v894_v44 }
 0x262   :  { %v935_v49 = vmul.bf16 1009007652, %v933_v46 }
 0x263   :  { %v936_v50 = vmul.bf16 1009007652, %v934_v48 }
 0x264   :  { %v937_v52 = vmax.bf16 %v935_v49, %v933_v46 }
 0x265   :  { %v938_v51 = vmax.bf16 %v936_v50, %v934_v48 }
 0x267   :  { %1106 = vmatprep.mubr.bf16.mxu1 %v938_v51 }
 0x268   :  { %1107 = vmatmul.mubr.bf16.vlgmr.msra.gmra.mrb[8].mxu1 %v937_v52 }
 0x33b   :  { %v1263_v20 = vpop.f32.mrb[8].mxu1 }
 0x33c   :  { %v1264_v54 = vpop.f32.mrb[9].mxu1 }
 0x33d   :  { %v1265_v25 = vadd.f32 %v1264_v54, %v1263_v20  ;;  %v1266_v55 = vpop.f32.mrb[10].mxu1 }
 0x33e   :  { %v1267_v56 = vpop.f32.mrb[11].mxu1 }
 0x33f   :  { %v1109_v57 = vadd.f32 %v1265_v25, %v1230_v53 }
 0x341   :  { %1114 = vst [vmem:[#allocation10] sm:$0xff] %v1109_v57 }
 0x342   :  { %1545 = shalt.err (!%p1542_p8)
}
 0x343   :  { %s1546_s6 = scalar_lea.hbm %s1717_s7, 128 }
 0x344   :  { %p1547_p9 = scmp.ne.s32.totalorder %s1717_s7, %s1546_s6  ;;  %p1550_p10 = scmp.lt.u32.totalorder %s1546_s6, %s1717_s7 }
 0x346   :  { %p1552_p11 = pnand %p1550_p10, %p1547_p9 }
 0x348   :  { %1555 = shalt.err (!%p1552_p11)
}
 0x349   :  { %1124 = dma.vmem_to_hbm [thread:$0]  %s1122_s9, 128, %s1717_s7, [#allocation4]  }
 0x34a   :  { %1562 = dma.done.wait [#allocation4], 128  }
 0x34b   :  { %1563 = vsyncadd [#allocation4], 4294967168 }
 0x34c   :  { %1128 = vsyncpa [#allocation3], 1 }
 0x34d   :  { %1129 = vsyncpa [#allocation6], 1 }
 0x34e   :  { %1130 = vsyncpa [#allocation9], 1 }
 0x34f   :  { %1131 = vsyncpa [#allocation4], 1 }

</bundles_post_ra>
